<compile_context>
chip_gen: v5e
topology: v5e:2x2
jax: 0.10.0
libtpu: 0.0.40
codegen_flags: <defaults>
</compile_context>

<pallas_src>
import functools

import jax
import jax.numpy as jnp
from jax.experimental import pallas as pl
from jax.experimental.pallas import tpu as pltpu

_LANE = 128        # lane width
_SUBLANE = 16      # bf16 sublane packing (also satisfies the f32 requirement of 8)
_NEG = -1e30       # mask value for padded logit lanes
_TILE_M_CAP = 512  # max batch-tile rows per grid step


def _round_up(n, m):
    return ((n + m - 1) // m) * m


def _tpu_generation():
    try:
        kind = jax.devices()[0].device_kind.lower()
    except Exception:
        return 0
    for g in (7, 6, 5, 4):
        if f"v{g}" in kind:
            return g
    return 0


_GEN = _tpu_generation()
_NUM_TC = 2 if _GEN >= 7 else 1                                # v7x: 2 TCs/chip
_EPILOGUE_DT = jnp.bfloat16 if _GEN >= 6 else jnp.float32      # bf16 VPU on v6e/v7x only
_OUT_STORE_DT = jnp.bfloat16 if _GEN == 5 else jnp.float32     # lighter writeback on v5


def _mlp_kernel(x_ref, w1_ref, b1_ref, w2_ref, b2_ref, w3_ref, b3_ref, o_ref):
    # fc1: bf16 MXU matmul, f32 accumulation; epilogue dtype follows the bias dtype
    h1 = jnp.dot(x_ref[...], w1_ref[...], preferred_element_type=jnp.float32)
    h1 = jnp.maximum(h1.astype(b1_ref.dtype) + b1_ref[...], 0)
    # fc2 + ReLU
    h2 = jnp.dot(h1.astype(w2_ref.dtype), w2_ref[...],
                 preferred_element_type=jnp.float32)
    h2 = jnp.maximum(h2.astype(b2_ref.dtype) + b2_ref[...], 0)
    # fc3 (padded logit lanes carry a -1e30 bias -> vanish under softmax), f32
    logits = jnp.dot(h2.astype(w3_ref.dtype), w3_ref[...],
                     preferred_element_type=jnp.float32) + b3_ref[...]
    # numerically stable softmax over the feature axis
    m = jnp.max(logits, axis=-1, keepdims=True)
    e = jnp.exp(logits - m)
    denom = jnp.sum(e, axis=-1, keepdims=True)
    o_ref[...] = (e * pl.reciprocal(denom, approx=True)).astype(o_ref.dtype)


@functools.partial(jax.jit, static_argnames=("n_out",))
def _forward_padded(x, w1p, b1p, w2p, b2p, w3p, b3p, *, n_out):
    batch, k = x.shape
    h1 = w1p.shape[1]
    h2 = w2p.shape[1]
    out = w3p.shape[1]

    # ---- batch (M) tiling -----------------------------------------------------
    pb16 = _round_up(max(batch, _SUBLANE), _SUBLANE)
    if _NUM_TC > 1 and batch > 32:
        # ensure >= 2 grid steps so both v7x TensorCores get work
        tile_m = min(_TILE_M_CAP, _round_up(-(-pb16 // _NUM_TC), _SUBLANE))
    else:
        tile_m = min(_TILE_M_CAP, pb16)
    pb = _round_up(batch, tile_m)

    # only the activation is padded/cast per call (weights were done at init)
    xp = jnp.pad(x, ((0, pb - batch), (0, 0))).astype(jnp.bfloat16)

    const = lambda i: (0, 0)  # resident weights/biases: DMA'd once, stay in VMEM
    ep_isz = jnp.dtype(_EPILOGUE_DT).itemsize
    out_isz = jnp.dtype(_OUT_STORE_DT).itemsize
    cost = pl.CostEstimate(
        flops=2 * pb * (k * h1 + h1 * h2 + h2 * out),
        transcendentals=pb * out,
        bytes_accessed=(xp.size * 2
                        + (w1p.size + w2p.size + w3p.size) * 2
                        + (b1p.size + b2p.size) * ep_isz + b3p.size * 4
                        + pb * out * out_isz),
    )

    out_padded = pl.pallas_call(
        _mlp_kernel,
        out_shape=jax.ShapeDtypeStruct((pb, out), _OUT_STORE_DT),
        grid=(pb // tile_m,),
        in_specs=[
            pl.BlockSpec((tile_m, k), lambda i: (i, 0)),   # x tile (pipelined)
            pl.BlockSpec((k, h1), const),                  # w1 resident
            pl.BlockSpec((1, h1), const),                  # b1 resident
            pl.BlockSpec((h1, h2), const),                 # w2 resident
            pl.BlockSpec((1, h2), const),                  # b2 resident
            pl.BlockSpec((h2, out), const),                # w3 resident
            pl.BlockSpec((1, out), const),                 # b3 resident (masked pad)
        ],
        out_specs=pl.BlockSpec((tile_m, out), lambda i: (i, 0)),  # lane-dense store
        compiler_params=pltpu.CompilerParams(
            dimension_semantics=("parallel",),   # shard batch tiles across TCs (v7x)
        ),
        cost_estimate=cost,
    )(xp, w1p, b1p, w2p, b2p, w3p, b3p)

    return out_padded[:batch, :n_out].astype(jnp.float32)


def make_linear_net_forward(w1, b1, w2, b2, w3, b3):
    """Pad + cast parameters ONCE (off the per-call hot path); return forward(x)."""
    h1 = _round_up(w1.shape[1], _LANE)    # 1000 -> 1024
    h2 = _round_up(w2.shape[1], _LANE)    # 100  -> 128
    out = _round_up(w3.shape[1], _LANE)   # 10   -> 128
    n_out = w3.shape[1]

    w1p = jnp.pad(w1, ((0, 0), (0, h1 - w1.shape[1]))).astype(jnp.bfloat16)
    w2p = jnp.pad(w2, ((0, h1 - w2.shape[0]), (0, h2 - w2.shape[1]))).astype(jnp.bfloat16)
    w3p = jnp.pad(w3, ((0, h2 - w3.shape[0]), (0, out - w3.shape[1]))).astype(jnp.bfloat16)
    b1p = jnp.pad(b1.reshape(1, -1), ((0, 0), (0, h1 - w1.shape[1]))).astype(_EPILOGUE_DT)
    b2p = jnp.pad(b2.reshape(1, -1), ((0, 0), (0, h2 - w2.shape[1]))).astype(_EPILOGUE_DT)
    b3p = jnp.pad(b3.reshape(1, -1), ((0, 0), (0, out - n_out)),
                  constant_values=_NEG).astype(jnp.float32)   # mask padded logit lanes

    params = jax.block_until_ready((w1p, b1p, w2p, b2p, w3p, b3p))  # materialize at init

    def forward(x):
        return _forward_padded(x, *params, n_out=n_out)

    return forward


def init_linear_params(key, in_dim, out_dim):
    """PyTorch nn.Linear default init: U(-1/sqrt(in_dim), 1/sqrt(in_dim))."""
    kw, kb = jax.random.split(key)
    bound = 1.0 / jnp.sqrt(jnp.float32(in_dim))
    w = jax.random.uniform(kw, (in_dim, out_dim), jnp.float32, -bound, bound)
    b = jax.random.uniform(kb, (1, out_dim), jnp.float32, -bound, bound)
    return w, b


def _reference_forward(x, w1, b1, w2, b2, w3, b3):
    h = jax.nn.relu(x @ w1 + b1.reshape(1, -1))
    h = jax.nn.relu(h @ w2 + b2.reshape(1, -1))
    return jax.nn.softmax(h @ w3 + b3.reshape(1, -1), axis=-1)


if __name__ == "__main__":
    key = jax.random.PRNGKey(0)
    k_x, k1, k2, k3 = jax.random.split(key, 4)

    batch = 2
    in_features = 32

    x = jax.random.normal(k_x, (batch, in_features), jnp.float32)
    w1, b1 = init_linear_params(k1, in_features, 1000)
    w2, b2 = init_linear_params(k2, 1000, 100)
    w3, b3 = init_linear_params(k3, 100, 10)

    forward = make_linear_net_forward(w1, b1, w2, b2, w3, b3)
    out = forward(x)
    out = jax.block_until_ready(out)

    # sanity: shape, rows ~sum to 1, and close to a pure-JAX f32 reference
    assert out.shape == (batch, 10)
    assert jnp.allclose(jnp.sum(out, axis=1), 1.0, atol=1e-2)
    ref = _reference_forward(x, w1, b1, w2, b2, w3, b3)
    assert jnp.allclose(out, ref, atol=2e-2), float(jnp.max(jnp.abs(out - ref)))
    print("KERNEL_OK")
</pallas_src>

<mosaic_0001>
module attributes {stable_mosaic.version = 11 : i64} {
  func.func @_mlp_kernel(%arg0: i32, %arg1: memref<16x32xbf16, #tpu.memory_space<vmem>>, %arg2: memref<32x1024xbf16, #tpu.memory_space<vmem>>, %arg3: memref<1x1024xf32, #tpu.memory_space<vmem>>, %arg4: memref<1024x128xbf16, #tpu.memory_space<vmem>>, %arg5: memref<1x128xf32, #tpu.memory_space<vmem>>, %arg6: memref<128x128xbf16, #tpu.memory_space<vmem>>, %arg7: memref<1x128xf32, #tpu.memory_space<vmem>>, %arg8: memref<16x128xf32, #tpu.memory_space<vmem>>) attributes {dimension_semantics = [#tpu.dimension_semantics<parallel>], iteration_bounds = array<i64: 1>, scalar_prefetch = 0 : i64, scratch_operands = 0 : i64, tpu.core_type = #tpu.core_type<tc>, window_params = [{transform_indices = @transform_0, window_bounds = array<i64: 16, 32>}, {pipeline_mode = #tpu.pipeline_mode<synchronous>, transform_indices = @transform_1, window_bounds = array<i64: 32, 1024>}, {pipeline_mode = #tpu.pipeline_mode<synchronous>, transform_indices = @transform_2, window_bounds = array<i64: 1, 1024>}, {pipeline_mode = #tpu.pipeline_mode<synchronous>, transform_indices = @transform_3, window_bounds = array<i64: 1024, 128>}, {pipeline_mode = #tpu.pipeline_mode<synchronous>, transform_indices = @transform_4, window_bounds = array<i64: 1, 128>}, {pipeline_mode = #tpu.pipeline_mode<synchronous>, transform_indices = @transform_5, window_bounds = array<i64: 128, 128>}, {pipeline_mode = #tpu.pipeline_mode<synchronous>, transform_indices = @transform_6, window_bounds = array<i64: 1, 128>}, {transform_indices = @transform_7, window_bounds = array<i64: 16, 128>}]} {
    %c0 = arith.constant 0 : index
    %c0_0 = arith.constant 0 : index
    %0 = vector.load %arg1[%c0, %c0_0] : memref<16x32xbf16, #tpu.memory_space<vmem>>, vector<16x32xbf16>
    %c0_1 = arith.constant 0 : index
    %c0_2 = arith.constant 0 : index
    %1 = vector.load %arg2[%c0_1, %c0_2] : memref<32x1024xbf16, #tpu.memory_space<vmem>>, vector<32x1024xbf16>
    %cst = arith.constant dense<0.000000e+00> : vector<16x1024xf32>
    %2 = tpu.matmul %0, %1, %cst {dimension_numbers = #tpu.dot_dimension_numbers<[1], [0], [0], [1], [0, 0, 1, 1], [], []>} : vector<16x32xbf16>, vector<32x1024xbf16>, vector<16x1024xf32> -> vector<16x1024xf32>
    %c0_3 = arith.constant 0 : index
    %c0_4 = arith.constant 0 : index
    %3 = vector.load %arg3[%c0_3, %c0_4] : memref<1x1024xf32, #tpu.memory_space<vmem>>, vector<1x1024xf32>
    %4 = vector.broadcast %3 : vector<1x1024xf32> to vector<16x1024xf32>
    %5 = arith.addf %2, %4 : vector<16x1024xf32>
    %cst_5 = arith.constant 0.000000e+00 : f32
    %6 = vector.broadcast %cst_5 : f32 to vector<16x1024xf32>
    %7 = arith.maximumf %5, %6 : vector<16x1024xf32>
    %8 = arith.truncf %7 : vector<16x1024xf32> to vector<16x1024xbf16>
    %c0_6 = arith.constant 0 : index
    %c0_7 = arith.constant 0 : index
    %9 = vector.load %arg4[%c0_6, %c0_7] : memref<1024x128xbf16, #tpu.memory_space<vmem>>, vector<1024x128xbf16>
    %cst_8 = arith.constant dense<0.000000e+00> : vector<16x128xf32>
    %10 = tpu.matmul %8, %9, %cst_8 {dimension_numbers = #tpu.dot_dimension_numbers<[1], [0], [0], [1], [0, 0, 1, 1], [], []>} : vector<16x1024xbf16>, vector<1024x128xbf16>, vector<16x128xf32> -> vector<16x128xf32>
    %c0_9 = arith.constant 0 : index
    %c0_10 = arith.constant 0 : index
    %11 = vector.load %arg5[%c0_9, %c0_10] : memref<1x128xf32, #tpu.memory_space<vmem>>, vector<1x128xf32>
    %12 = vector.broadcast %11 : vector<1x128xf32> to vector<16x128xf32>
    %13 = arith.addf %10, %12 : vector<16x128xf32>
    %cst_11 = arith.constant 0.000000e+00 : f32
    %14 = vector.broadcast %cst_11 : f32 to vector<16x128xf32>
    %15 = arith.maximumf %13, %14 : vector<16x128xf32>
    %16 = arith.truncf %15 : vector<16x128xf32> to vector<16x128xbf16>
    %c0_12 = arith.constant 0 : index
    %c0_13 = arith.constant 0 : index
    %17 = vector.load %arg6[%c0_12, %c0_13] : memref<128x128xbf16, #tpu.memory_space<vmem>>, vector<128x128xbf16>
    %cst_14 = arith.constant dense<0.000000e+00> : vector<16x128xf32>
    %18 = tpu.matmul %16, %17, %cst_14 {dimension_numbers = #tpu.dot_dimension_numbers<[1], [0], [0], [1], [0, 0, 1, 1], [], []>} : vector<16x128xbf16>, vector<128x128xbf16>, vector<16x128xf32> -> vector<16x128xf32>
    %c0_15 = arith.constant 0 : index
    %c0_16 = arith.constant 0 : index
    %19 = vector.load %arg7[%c0_15, %c0_16] : memref<1x128xf32, #tpu.memory_space<vmem>>, vector<1x128xf32>
    %20 = vector.broadcast %19 : vector<1x128xf32> to vector<16x128xf32>
    %21 = arith.addf %18, %20 : vector<16x128xf32>
    %cst_17 = arith.constant dense<0xFF800000> : vector<16xf32>
    %22 = vector.multi_reduction <maximumf>, %21, %cst_17 [1] : vector<16x128xf32> to vector<16xf32>
    %23 = vector.shape_cast %22 : vector<16xf32> to vector<16x1xf32>
    %24 = vector.broadcast %23 : vector<16x1xf32> to vector<16x128xf32>
    %25 = arith.subf %21, %24 : vector<16x128xf32>
    %26 = math.exp %25 : vector<16x128xf32>
    %cst_18 = arith.constant dense<0.000000e+00> : vector<16xf32>
    %27 = vector.multi_reduction <add>, %26, %cst_18 [1] : vector<16x128xf32> to vector<16xf32>
    %28 = vector.shape_cast %27 : vector<16xf32> to vector<16x1xf32>
    %29 = tpu.reciprocal %28 {approx = true} : vector<16x1xf32> -> vector<16x1xf32>
    %30 = vector.broadcast %29 : vector<16x1xf32> to vector<16x128xf32>
    %31 = arith.mulf %26, %30 : vector<16x128xf32>
    %c0_19 = arith.constant 0 : index
    %c0_20 = arith.constant 0 : index
    %32 = vector.load %arg8[%c0_19, %c0_20] : memref<16x128xf32, #tpu.memory_space<vmem>>, vector<16x128xf32>
    tpu.vector_store %arg8[%c0_19, %c0_20], %31 {strides = array<i32>} : memref<16x128xf32, #tpu.memory_space<vmem>>, vector<16x128xf32>,
    return
  }
  func.func @transform_0(%arg0: i32) -> (i32, i32) {
    %c0_i32 = arith.constant 0 : i32
    %c0_i32_0 = arith.constant 0 : i32
    return %arg0, %c0_i32 : i32, i32
  }
  func.func @transform_1(%arg0: i32) -> (i32, i32) {
    %c0_i32 = arith.constant 0 : i32
    %c0_i32_0 = arith.constant 0 : i32
    %c0_i32_1 = arith.constant 0 : i32
    return %c0_i32, %c0_i32_0 : i32, i32
  }
  func.func @transform_2(%arg0: i32) -> (i32, i32) {
    %c0_i32 = arith.constant 0 : i32
    %c0_i32_0 = arith.constant 0 : i32
    %c0_i32_1 = arith.constant 0 : i32
    return %c0_i32, %c0_i32_0 : i32, i32
  }
  func.func @transform_3(%arg0: i32) -> (i32, i32) {
    %c0_i32 = arith.constant 0 : i32
    %c0_i32_0 = arith.constant 0 : i32
    %c0_i32_1 = arith.constant 0 : i32
    return %c0_i32, %c0_i32_0 : i32, i32
  }
  func.func @transform_4(%arg0: i32) -> (i32, i32) {
    %c0_i32 = arith.constant 0 : i32
    %c0_i32_0 = arith.constant 0 : i32
    %c0_i32_1 = arith.constant 0 : i32
    return %c0_i32, %c0_i32_0 : i32, i32
  }
  func.func @transform_5(%arg0: i32) -> (i32, i32) {
    %c0_i32 = arith.constant 0 : i32
    %c0_i32_0 = arith.constant 0 : i32
    %c0_i32_1 = arith.constant 0 : i32
    return %c0_i32, %c0_i32_0 : i32, i32
  }
  func.func @transform_6(%arg0: i32) -> (i32, i32) {
    %c0_i32 = arith.constant 0 : i32
    %c0_i32_0 = arith.constant 0 : i32
    %c0_i32_1 = arith.constant 0 : i32
    return %c0_i32, %c0_i32_0 : i32, i32
  }
  func.func @transform_7(%arg0: i32) -> (i32, i32) {
    %c0_i32 = arith.constant 0 : i32
    %c0_i32_0 = arith.constant 0 : i32
    return %arg0, %c0_i32 : i32, i32
  }
}

</mosaic_0001>

<bundles_post_ra>
// kernel: _forward_padded.1
= control target key start
LH: loop header
LB: loop body
LE: loop exit
PB: predicated region body
PF: predicated region fallthrough
CT: control target
= control target key end

     0   :  { %12 = vsyncpa [#allocation3], 0  ;;  %s1722_s0 = inlined_call_operand.vmem [shape: bf16[16,32], index: 0, kind: input, shape index: {}]   ;;  %s1723_s1 = inlined_call_operand.hbm [shape: bf16[32,1024], index: 1, kind: input, shape index: {}]   ;;  %s1724_s2 = inlined_call_operand.vmem [shape: f32[1,1024], index: 2, kind: input, shape index: {}]   ;;  %s1725_s3 = inlined_call_operand.hbm [shape: bf16[1024,128], index: 3, kind: input, shape index: {}]   ;;  %s1726_s4 = inlined_call_operand.vmem [shape: f32[1,128], index: 4, kind: input, shape index: {}]   ;;  %s1727_s5 = inlined_call_operand.hbm [shape: bf16[128,128], index: 5, kind: input, shape index: {}]   ;;  %s1728_s6 = inlined_call_operand.vmem [shape: f32[1,128], index: 6, kind: input, shape index: {}]   ;;  %s1729_s7 = inlined_call_operand.vmem [shape: f32[16,128], index: 7, kind: output, shape index: {}]  }
   0x1   :  { %13 = vsyncpa [#allocation5], 0  ;;  %s35_s26 = sshll.u32 %s1725_s3, 4  ;;  %s1620_s27 = smov [#allocation4]   ;;  %s36_s26 = int_to_ptr.hbm [resolvable:$true] %s35_s26 }
   0x2   :  { %s37_s28 = sshll.u32 %s1620_s27, 4  ;;  %s20_s8 = sshll.u32 %s1723_s1, 4  ;;  %s38_s28 = int_to_ptr.vmem [resolvable:$true] %s37_s28  ;;  %s21_s8 = int_to_ptr.hbm [resolvable:$true] %s20_s8 }
   0x3   :  { %s1621_s9 = smov 64   ;;  %s1622_s10 = smov 4  }
   0x4   :  { %43 = dma.hbm_to_vmem [thread:$0]  %s36_s26, 8192, %s38_s28, [#allocation5], %s1621_s9, %s1621_s9, %s1622_s10  }
   0x5   :  { %s1623_s11 = smov [#allocation2]   ;;  %s1624_s13 = smov 512  }
   0x6   :  { %s22_s12 = sshll.u32 %s1623_s11, 4  ;;  %s1625_s14 = smov 32   ;;  %s23_s12 = int_to_ptr.vmem [resolvable:$true] %s22_s12 }
   0x7   :  { %28 = dma.hbm_to_vmem [thread:$0]  %s21_s8, 2048, %s23_s12, [#allocation3], %s1624_s13, %s1624_s13, %s1625_s14  }
   0x8   :  { %s50_s16 = sshll.u32 %s1727_s5, 4  ;;  %s1626_s17 = smov [#allocation6]   ;;  %s51_s16 = int_to_ptr.hbm [resolvable:$true] %s50_s16 }
   0x9   :  { %s52_s18 = sshll.u32 %s1626_s17, 4  ;;  %s53_s18 = int_to_ptr.vmem [resolvable:$true] %s52_s18 }
   0xa   :  { %58 = dma.hbm_to_vmem [thread:$0]  %s51_s16, 1024, %s53_s18, [#allocation5], %s1621_s9, %s1621_s9, %s1622_s10  }
   0xb   :  { %1616 = dma.done.wait [#allocation3], 2048  }
   0xc   :  { %1617 = vsyncadd [#allocation3], 4294965248 }
   0xd   :  { %1618 = dma.done.wait [#allocation5], 9216  }
   0xe   :  { %1619 = vsyncadd [#allocation5], 4294958080  ;;  %v1112_v0 = vld [vmem:[#allocation2 + $0x40] sm:$0xf]  ;;  %v1120_v2 = vld [vmem:[#allocation2 + $0x48] sm:$0xf] }
   0xf   :  { %v1451_v1 = vld [vmem:[#allocation2 + $0x5c] sm:$0xf0]  ;;  %v1452_v4 = vld [vmem:[#allocation2 + $0x64] sm:$0xf0]  ;;  %v1448_v5 = vld [vmem:[#allocation2 + $0x4c] sm:$0xf] }
  0x10   :  { %v1113_v3 = vor.u32 %v1451_v1, %v1112_v0  ;;  %v1122_v6 = vld [vmem:[#allocation2 + $0x68] sm:$0xf0]  ;;  %v1121_v7 = vor.u32 %v1452_v4, %v1120_v2  ;;  %v1080_v9 = vld [vmem:[#allocation2] sm:$0xf]  ;;  %v1088_v11 = vld [vmem:[#allocation2 + $0x8] sm:$0xf] }
  0x11   :  { %v1125_v8 = vor.u32 %v1448_v5, %v1122_v6  ;;  %v1443_v10 = vld [vmem:[#allocation2 + $0x1c] sm:$0xf0]  ;;  %v1444_v13 = vld [vmem:[#allocation2 + $0x24] sm:$0xf0]  ;;  %v1440_v14 = vld [vmem:[#allocation2 + $0xc] sm:$0xf] }
  0x12   :  { %205 = vmatpush.bf16.msra.mxu1 %v1113_v3  ;;  %v1081_v12 = vor.u32 %v1443_v10, %v1080_v9  ;;  %v1090_v15 = vld [vmem:[#allocation2 + $0x28] sm:$0xf0]  ;;  %233 = vmatpush.bf16.msra.mxu2 %v1121_v7  ;;  %v1089_v16 = vor.u32 %v1444_v13, %v1088_v11  ;;  %v1679_v18 = vld [vmem:[%s1722_s0] sm:$0xff]  ;;  %vm195_vm0 = vcmask 261120   ;;  %v1136_v22 = vld [vmem:[#allocation2 + $0x58] sm:$0xf] }
  0x13   :  { %247 = vmatpush.bf16.msra.mxu3 %v1125_v8  ;;  %v1093_v17 = vor.u32 %v1440_v14, %v1090_v15  ;;  %v1447_v19 = vld [vmem:[#allocation2 + $0x44] sm:$0xf]  ;;  %v1454_v23 = vld [vmem:[#allocation2 + $0x74] sm:$0xf0]  ;;  %v1450_v27 = vld [vmem:[#allocation2 + $0x5c] sm:$0xf] }
  0x14   :  { %v1114_v20 = vld [vmem:[#allocation2 + $0x60] sm:$0xf0]  ;;  %v1137_v25 = vor.u32 %v1454_v23, %v1136_v22  ;;  %v1138_v28 = vld [vmem:[#allocation2 + $0x78] sm:$0xf0]  ;;  %v1128_v30 = vld [vmem:[#allocation2 + $0x50] sm:$0xf] }
  0x15   :  { %v1117_v21 = vor.u32 %v1447_v19, %v1114_v20  ;;  %v1439_v24 = vld [vmem:[#allocation2 + $0x4] sm:$0xf]  ;;  %v1141_v29 = vor.u32 %v1450_v27, %v1138_v28  ;;  %v1453_v31 = vld [vmem:[#allocation2 + $0x6c] sm:$0xf0]  ;;  %v1104_v35 = vld [vmem:[#allocation2 + $0x18] sm:$0xf] }
  0x16   :  { %v1082_v26 = vld [vmem:[#allocation2 + $0x20] sm:$0xf0]  ;;  %206 = vmatpush.bf16.msra.mxu1 %v1081_v12  ;;  %v1096_v32 = vld [vmem:[#allocation2 + $0x10] sm:$0xf]  ;;  %234 = vmatpush.bf16.msra.mxu2 %v1089_v16  ;;  %v1129_v33 = vor.u32 %v1453_v31, %v1128_v30  ;;  %v1446_v36 = vld [vmem:[#allocation2 + $0x34] sm:$0xf0] }
  0x17   :  { %248 = vmatpush.bf16.msra.mxu3 %v1093_v17  ;;  %v1445_v34 = vld [vmem:[#allocation2 + $0x2c] sm:$0xf0]  ;;  %v1085_v37 = vor.u32 %v1439_v24, %v1082_v26  ;;  %v1105_v38 = vor.u32 %v1446_v36, %v1104_v35  ;;  %v1442_v39 = vld [vmem:[#allocation2 + $0x1c] sm:$0xf]  ;;  %v1449_v41 = vld [vmem:[#allocation2 + $0x54] sm:$0xf] }
  0x18   :  { %v1106_v40 = vld [vmem:[#allocation2 + $0x38] sm:$0xf0]  ;;  %v1130_v43 = vld [vmem:[#allocation2 + $0x70] sm:$0xf0]  ;;  %261 = vmatpush.bf16.msra.mxu0 %v1129_v33  ;;  %v1097_v48 = vor.u32 %v1445_v34, %v1096_v32  ;;  %v1476_v55 = vld [vmem:[#allocation4 + $0xa8] sm:$0xff] }
  0x19   :  { %1142 = vmatmul.msk.bf16.vlgmr.msra.gmra.mxu1 %vm195_vm0, %v1679_v18  ;;  %v1109_v42 = vor.u32 %v1442_v39, %v1106_v40  ;;  %1144 = vmatmul.msk.bf16.vlgmr.msra.gmra.mxu2 %vm195_vm0, %v1679_v18  ;;  %v1133_v44 = vor.u32 %v1449_v41, %v1130_v43  ;;  %v1441_v45 = vld [vmem:[#allocation2 + $0x14] sm:$0xf]  ;;  %v1478_v47 = vld [vmem:[#allocation4 + $0xb8] sm:$0xff]  ;;  %v1484_v56 = vld [vmem:[#allocation4 + $0xe8] sm:$0xff] }
  0x1a   :  { %219 = vmatpush.bf16.msrb.mxu1 %v1117_v21  ;;  %289 = vmatpush.bf16.msrb.mxu2 %v1137_v25  ;;  %v1098_v46 = vld [vmem:[#allocation2 + $0x30] sm:$0xf0]  ;;  %v1486_v49 = vld [vmem:[#allocation4 + $0xf8] sm:$0xff]  ;;  %v1460_v57 = vld [vmem:[#allocation4 + $0x28] sm:$0xff] }
  0x1b   :  { %303 = vmatpush.bf16.msrb.mxu3 %v1141_v29  ;;  %v1462_v50 = vld [vmem:[#allocation4 + $0x38] sm:$0xff]  ;;  %v1101_v51 = vor.u32 %v1441_v45, %v1098_v46  ;;  %v1477_v52 = vld [vmem:[#allocation4 + $0xb0] sm:$0xff]  ;;  %v1475_v59 = vld [vmem:[#allocation4 + $0xa0] sm:$0xff] }
  0x1c   :  { %1145 = vmatmul.msk.bf16.vlgmr.msra.gmra.mxu3 %vm195_vm0, %v1679_v18  ;;  %262 = vmatpush.bf16.msra.mxu0 %v1097_v48  ;;  %v1485_v53 = vld [vmem:[#allocation4 + $0xf0] sm:$0xff]  ;;  %v1470_v58 = vld [vmem:[#allocation4 + $0x78] sm:$0xff]  ;;  %v1459_v60 = vld [vmem:[#allocation4 + $0x20] sm:$0xff] }
  0x1d   :  { %v1461_v54 = vld [vmem:[#allocation4 + $0x30] sm:$0xff]  ;;  %v1483_v61 = vld [vmem:[#allocation4 + $0xe0] sm:$0xff]  ;;  %v1474_v63 = vld [vmem:[#allocation4 + $0x98] sm:$0xff] }
  0x1e   :  { %220 = vmatpush.bf16.msrb.mxu1 %v1085_v37  ;;  %290 = vmatpush.bf16.msrb.mxu2 %v1105_v38  ;;  %v1469_v62 = vld [vmem:[#allocation4 + $0x70] sm:$0xff]  ;;  %v1458_v0 = vld [vmem:[#allocation4 + $0x18] sm:$0xff]  ;;  %v1468_v2 = vld [vmem:[#allocation4 + $0x68] sm:$0xff] }
  0x1f   :  { %304 = vmatpush.bf16.msrb.mxu3 %v1109_v42  ;;  %1146 = vmatmul.msk.bf16.vlgmr.msra.gmra.mxu0 %vm195_vm0, %v1679_v18  ;;  %v1482_v1 = vld [vmem:[#allocation4 + $0xd8] sm:$0xff]  ;;  %v1473_v3 = vld [vmem:[#allocation4 + $0x90] sm:$0xff]  ;;  %v1467_v6 = vld [vmem:[#allocation4 + $0x60] sm:$0xff] }
  0x20   :  { %851 = vmatpush.bf16.msrb.mxu0 %v1462_v50  ;;  %v1457_v4 = vld [vmem:[#allocation4 + $0x10] sm:$0xff]  ;;  %v1456_v7 = vld [vmem:[#allocation4 + $0x8] sm:$0xff]  ;;  %v1455_v8 = vld [vmem:[#allocation4] sm:$0xff] }
  0x21   :  { %v1481_v5 = vld [vmem:[#allocation4 + $0xd0] sm:$0xff]  ;;  %v1494_v9 = vld [vmem:[#allocation4 + $0x138] sm:$0xff]  ;;  %v1472_v10 = vld [vmem:[#allocation4 + $0x88] sm:$0xff] }
  0x22   :  { %275 = vmatpush.bf16.msra.mxu1 %v1133_v44  ;;  %879 = vmatpush.bf16.msra.mxu2 %v1478_v47  ;;  %v1480_v11 = vld [vmem:[#allocation4 + $0xc8] sm:$0xff]  ;;  %v1466_v12 = vld [vmem:[#allocation4 + $0x58] sm:$0xff]  ;;  %v1493_v13 = vld [vmem:[#allocation4 + $0x130] sm:$0xff] }
  0x23   :  { %893 = vmatpush.bf16.msra.mxu3 %v1486_v49  ;;  %v1471_v14 = vld [vmem:[#allocation4 + $0x80] sm:$0xff]  ;;  %v1510_v16 = vld [vmem:[#allocation4 + $0x1b8] sm:$0xff]  ;;  %v1465_v19 = vld [vmem:[#allocation4 + $0x50] sm:$0xff] }
  0x24   :  { %852 = vmatpush.bf16.msrb.mxu0 %v1461_v54  ;;  %v1479_v15 = vld [vmem:[#allocation4 + $0xc0] sm:$0xff]  ;;  %v1518_v17 = vld [vmem:[#allocation4 + $0x1f8] sm:$0xff]  ;;  %v1509_v20 = vld [vmem:[#allocation4 + $0x1b0] sm:$0xff] }
  0x25   :  { %v1517_v21 = vld [vmem:[#allocation4 + $0x1f0] sm:$0xff]  ;;  %v1464_v22 = vld [vmem:[#allocation4 + $0x48] sm:$0xff]  ;;  %v1491_v23 = vld [vmem:[#allocation4 + $0x120] sm:$0xff] }
  0x26   :  { %276 = vmatpush.bf16.msra.mxu1 %v1101_v51  ;;  %880 = vmatpush.bf16.msra.mxu2 %v1477_v52  ;;  %v1508_v24 = vld [vmem:[#allocation4 + $0x1a8] sm:$0xff]  ;;  %v1463_v26 = vld [vmem:[#allocation4 + $0x40] sm:$0xff]  ;;  %v1490_v27 = vld [vmem:[#allocation4 + $0x118] sm:$0xff] }
  0x27   :  { %894 = vmatpush.bf16.msra.mxu3 %v1485_v53  ;;  %v1516_v25 = vld [vmem:[#allocation4 + $0x1e8] sm:$0xff]  ;;  %v1502_v28 = vld [vmem:[#allocation4 + $0x178] sm:$0xff]  ;;  %v1507_v29 = vld [vmem:[#allocation4 + $0x1a0] sm:$0xff] }
  0x28   :  { %853 = vmatpush.bf16.msrb.mxu0 %v1460_v57  ;;  %v1515_v30 = vld [vmem:[#allocation4 + $0x1e0] sm:$0xff]  ;;  %v1489_v31 = vld [vmem:[#allocation4 + $0x110] sm:$0xff]  ;;  %v1506_v33 = vld [vmem:[#allocation4 + $0x198] sm:$0xff] }
  0x29   :  { %1143 = vmatmul.msk.bf16.vlgmr.msrb.gmra.mxu1 %vm195_vm0, %v1679_v18  ;;  %1148 = vmatmul.msk.bf16.vlgmr.msrb.gmra.mxu2 %vm195_vm0, %v1679_v18  ;;  %v1501_v32 = vld [vmem:[#allocation4 + $0x170] sm:$0xff]  ;;  %v1514_v34 = vld [vmem:[#allocation4 + $0x1d8] sm:$0xff]  ;;  %v1488_v35 = vld [vmem:[#allocation4 + $0x108] sm:$0xff] }
  0x2a   :  { %881 = vmatpush.bf16.msra.mxu2 %v1476_v55  ;;  %865 = vmatpush.bf16.msrb.mxu1 %v1470_v58  ;;  %v1500_v36 = vld [vmem:[#allocation4 + $0x168] sm:$0xff]  ;;  %v1505_v37 = vld [vmem:[#allocation4 + $0x190] sm:$0xff]  ;;  %v1487_v39 = vld [vmem:[#allocation4 + $0x100] sm:$0xff] }
  0x2b   :  { %895 = vmatpush.bf16.msra.mxu3 %v1484_v56  ;;  %v1513_v38 = vld [vmem:[#allocation4 + $0x1d0] sm:$0xff]  ;;  %v1499_v40 = vld [vmem:[#allocation4 + $0x160] sm:$0xff]  ;;  %v1504_v41 = vld [vmem:[#allocation4 + $0x188] sm:$0xff] }
  0x2c   :  { %1149 = vmatmul.msk.bf16.vlgmr.msrb.gmra.mxu3 %vm195_vm0, %v1679_v18  ;;  %854 = vmatpush.bf16.msrb.mxu0 %v1459_v60  ;;  %v1512_v42 = vld [vmem:[#allocation4 + $0x1c8] sm:$0xff]  ;;  %v1498_v43 = vld [vmem:[#allocation4 + $0x158] sm:$0xff]  ;;  %v1700_v44 = vld [vmem:[%s1724_s2] sm:$0xff] }
  0x2d   :  { %v1503_v46 = vld [vmem:[#allocation4 + $0x180] sm:$0xff]  ;;  %v94_v48 = vperm.slane %v1700_v44, 0  ;;  %v1497_v49 = vld [vmem:[#allocation4 + $0x150] sm:$0xff]  ;;  %v1496_v53 = vld [vmem:[#allocation4 + $0x148] sm:$0xff]  ;;  %v97_v54 = vperm.slane %v1700_v44, 3  ;;  %v96_v58 = vperm.slane %v1700_v44, 2 }
  0x2e   :  { %882 = vmatpush.bf16.msra.mxu2 %v1475_v59  ;;  %866 = vmatpush.bf16.msrb.mxu1 %v1469_v62  ;;  %v1511_v47 = vld [vmem:[#allocation4 + $0x1c0] sm:$0xff] }
  0x2f   :  { %896 = vmatpush.bf16.msra.mxu3 %v1483_v61  ;;  %v1495_v61 = vld [vmem:[#allocation4 + $0x140] sm:$0xff] }
  0x30   :  { %855 = vmatpush.bf16.msrb.mxu0 %v1458_v0 }
  0x32   :  { %883 = vmatpush.bf16.msra.mxu2 %v1474_v63  ;;  %867 = vmatpush.bf16.msrb.mxu1 %v1468_v2 }
  0x33   :  { %897 = vmatpush.bf16.msra.mxu3 %v1482_v1 }
  0x34   :  { %856 = vmatpush.bf16.msrb.mxu0 %v1457_v4 }
  0x36   :  { %884 = vmatpush.bf16.msra.mxu2 %v1473_v3  ;;  %868 = vmatpush.bf16.msrb.mxu1 %v1467_v6  ;;  %v98_v3 = vperm.slane %v1700_v44, 4 }
  0x37   :  { %898 = vmatpush.bf16.msra.mxu3 %v1481_v5 }
  0x38   :  { %857 = vmatpush.bf16.msrb.mxu0 %v1456_v7 }
  0x39   :  { %1147 = vmatmul.msk.bf16.vlgmr.msra.gmra.mxu1 %vm195_vm0, %v1679_v18  ;;  %v1492_v18 = vld [vmem:[#allocation4 + $0x128] sm:$0xff] }
  0x3a   :  { %885 = vmatpush.bf16.msra.mxu2 %v1472_v10  ;;  %869 = vmatpush.bf16.msrb.mxu1 %v1466_v12  ;;  %v95_v12 = vperm.slane %v1700_v44, 1 }
  0x3b   :  { %899 = vmatpush.bf16.msra.mxu3 %v1480_v11 }
  0x3c   :  { %858 = vmatpush.bf16.msrb.mxu0 %v1455_v8 }
  0x3e   :  { %886 = vmatpush.bf16.msra.mxu2 %v1471_v14  ;;  %870 = vmatpush.bf16.msrb.mxu1 %v1465_v19 }
  0x3f   :  { %900 = vmatpush.bf16.msra.mxu3 %v1479_v15 }
  0x40   :  { %907 = vmatpush.bf16.msra.mxu0 %v1494_v9 }
  0x42   :  { %935 = vmatpush.bf16.msrb.mxu2 %v1510_v16  ;;  %871 = vmatpush.bf16.msrb.mxu1 %v1464_v22  ;;  %v101_v22 = vperm.slane %v1700_v44, 7 }
  0x43   :  { %949 = vmatpush.bf16.msrb.mxu3 %v1518_v17 }
  0x44   :  { %908 = vmatpush.bf16.msra.mxu0 %v1493_v13 }
  0x46   :  { %936 = vmatpush.bf16.msrb.mxu2 %v1509_v20  ;;  %872 = vmatpush.bf16.msrb.mxu1 %v1463_v26 }
  0x47   :  { %950 = vmatpush.bf16.msrb.mxu3 %v1517_v21 }
  0x48   :  { %909 = vmatpush.bf16.msra.mxu0 %v1492_v18 }
  0x4a   :  { %937 = vmatpush.bf16.msrb.mxu2 %v1508_v24  ;;  %921 = vmatpush.bf16.msra.mxu1 %v1502_v28 }
  0x4b   :  { %951 = vmatpush.bf16.msrb.mxu3 %v1516_v25  ;;  %v100_v25 = vperm.slane %v1700_v44, 6 }
  0x4c   :  { %910 = vmatpush.bf16.msra.mxu0 %v1491_v23 }
  0x4e   :  { %938 = vmatpush.bf16.msrb.mxu2 %v1507_v29  ;;  %922 = vmatpush.bf16.msra.mxu1 %v1501_v32 }
  0x4f   :  { %952 = vmatpush.bf16.msrb.mxu3 %v1515_v30 }
  0x50   :  { %911 = vmatpush.bf16.msra.mxu0 %v1490_v27 }
  0x52   :  { %939 = vmatpush.bf16.msrb.mxu2 %v1506_v33  ;;  %923 = vmatpush.bf16.msra.mxu1 %v1500_v36 }
  0x53   :  { %953 = vmatpush.bf16.msrb.mxu3 %v1514_v34 }
  0x54   :  { %912 = vmatpush.bf16.msra.mxu0 %v1489_v31 }
  0x56   :  { %940 = vmatpush.bf16.msrb.mxu2 %v1505_v37  ;;  %924 = vmatpush.bf16.msra.mxu1 %v1499_v40 }
  0x57   :  { %954 = vmatpush.bf16.msrb.mxu3 %v1513_v38 }
  0x58   :  { %913 = vmatpush.bf16.msra.mxu0 %v1488_v35 }
  0x5a   :  { %941 = vmatpush.bf16.msrb.mxu2 %v1504_v41  ;;  %925 = vmatpush.bf16.msra.mxu1 %v1498_v43  ;;  %v99_v41 = vperm.slane %v1700_v44, 5  ;;  %v1522_v44 = vld [vmem:[#allocation6 + $0x18] sm:$0xff] }
  0x5b   :  { %955 = vmatpush.bf16.msrb.mxu3 %v1512_v42 }
  0x5c   :  { %914 = vmatpush.bf16.msra.mxu0 %v1487_v39 }
  0x5e   :  { %942 = vmatpush.bf16.msrb.mxu2 %v1503_v46  ;;  %926 = vmatpush.bf16.msra.mxu1 %v1497_v49 }
  0x5f   :  { %956 = vmatpush.bf16.msrb.mxu3 %v1511_v47 }
  0x62   :  { %927 = vmatpush.bf16.msra.mxu1 %v1496_v53  ;;  %v1524_v53 = vld [vmem:[#allocation6 + $0x28] sm:$0xff] }
  0x66   :  { %928 = vmatpush.bf16.msra.mxu1 %v1495_v61  ;;  %v1519_v61 = vld [vmem:[#allocation6] sm:$0xff] }
  0x96   :  { %v208_v45 = vpop.f32.mrf.mxu1 }
  0x97   :  { %v209_v50 = vadd.f32 %v208_v45, %v94_v48 }
  0x99   :  { %v311_v59 = vmax.f32 %v209_v50, 0.0 }
  0x9c   :  { %v236_v51 = vpop.f32.mrf.mxu2  ;;  %v264_v57 = vpop.f32.mrf.mxu0 }
  0x9d   :  { %v237_v0 = vadd.f32 %v236_v51, %v96_v58  ;;  %v265_v13 = vadd.f32 %v264_v57, %v98_v3  ;;  %v1526_v51 = vld [vmem:[#allocation6 + $0x38] sm:$0xff]  ;;  %v1520_v57 = vld [vmem:[#allocation6 + $0x8] sm:$0xff] }
  0x9e   :  { %v210_v55 = vpop.f32.mrf.mxu1 }
  0x9f   :  { %v250_v52 = vpop.f32.mrf.mxu3  ;;  %v211_v56 = vadd.f32 %v210_v55, %v94_v48  ;;  %v313_v9 = vmax.f32 %v237_v0, 0.0  ;;  %v315_v19 = vmax.f32 %v265_v13, 0.0  ;;  %v1521_v55 = vld [vmem:[#allocation6 + $0x10] sm:$0xff] }
  0xa0   :  { %v251_v62 = vadd.f32 %v250_v52, %v97_v54  ;;  %v1525_v52 = vld [vmem:[#allocation6 + $0x30] sm:$0xff] }
  0xa1   :  { %v319_v60 = vmax.f32 %v211_v56, 0.0 }
  0xa2   :  { %v314_v4 = vmax.f32 %v251_v62, 0.0 }
  0xa3   :  { %v327_v63 = vpack.c.bf16 %v319_v60, %v311_v59  ;;  %v1534_v60 = vld [vmem:[%s1726_s4] ss:$0 sm:$0xff] }
  0xa4   :  { %v238_v1 = vpop.f32.mrf.mxu2  ;;  %v266_v8 = vpop.f32.mrf.mxu0 }
  0xa5   :  { %859 = vmatmul.bf16.vlgmr.msrb.gmra.mxu0 %v327_v63  ;;  %v239_v5 = vadd.f32 %v238_v1, %v96_v58  ;;  %v267_v14 = vadd.f32 %v266_v8, %v98_v3 }
  0xa6   :  { %v222_v7 = vpop.f32.mrf.mxu1  ;;  %1034 = vmatpush.bf16.msrb.mxu0 %v1526_v51 }
  0xa7   :  { %v252_v2 = vpop.f32.mrf.mxu3  ;;  %v321_v10 = vmax.f32 %v239_v5, 0.0  ;;  %v223_v17 = vadd.f32 %v222_v7, %v95_v12  ;;  %v323_v21 = vmax.f32 %v267_v14, 0.0 }
  0xa8   :  { %v253_v6 = vadd.f32 %v252_v2, %v97_v54  ;;  %v1523_v54 = vld [vmem:[#allocation6 + $0x20] sm:$0xff] }
  0xa9   :  { %v329_v15 = vpack.c.bf16 %v321_v10, %v313_v9  ;;  %v312_v26 = vmax.f32 %v223_v17, 0.0  ;;  %v331_v28 = vpack.c.bf16 %v323_v21, %v315_v19 }
  0xaa   :  { %v322_v11 = vmax.f32 %v253_v6, 0.0  ;;  %1035 = vmatpush.bf16.msrb.mxu0 %v1525_v52 }
  0xab   :  { %887 = vmatmul.bf16.vlgmr.msra.gmra.mxu2 %v329_v15 }
  0xac   :  { %v330_v16 = vpack.c.bf16 %v322_v11, %v314_v4  ;;  %v292_v18 = vpop.f32.mrf.mxu2 }
  0xad   :  { %v293_v31 = vadd.f32 %v292_v18, %v100_v25 }
  0xae   :  { %901 = vmatmul.bf16.vlgmr.msra.gmra.mxu3 %v330_v16  ;;  %v224_v23 = vpop.f32.mrf.mxu1  ;;  %1036 = vmatpush.bf16.msrb.mxu0 %v1524_v53 }
  0xaf   :  { %v306_v20 = vpop.f32.mrf.mxu3  ;;  %v225_v24 = vadd.f32 %v224_v23, %v95_v12  ;;  %v317_v38 = vmax.f32 %v293_v31, 0.0 }
  0xb0   :  { %v307_v29 = vadd.f32 %v306_v20, %v101_v22 }
  0xb1   :  { %v320_v27 = vmax.f32 %v225_v24, 0.0 }
  0xb2   :  { %v318_v34 = vmax.f32 %v307_v29, 0.0  ;;  %1037 = vmatpush.bf16.msrb.mxu0 %v1523_v54 }
  0xb3   :  { %v328_v30 = vpack.c.bf16 %v320_v27, %v312_v26 }
  0xb4   :  { %v294_v32 = vpop.f32.mrf.mxu2 }
  0xb5   :  { %873 = vmatmul.bf16.vlgmr.msrb.gmra.mxu1 %v328_v30  ;;  %915 = vmatmul.bf16.vlgmr.msra.gmra.mxu0 %v331_v28  ;;  %v295_v35 = vadd.f32 %v294_v32, %v100_v25  ;;  %v1535_v30 = vld [vmem:[%s1728_s6] ss:$0 sm:$0xff] }
  0xb6   :  { %v278_v37 = vpop.f32.mrf.mxu1  ;;  %1038 = vmatpush.bf16.msrb.mxu0 %v1522_v44 }
  0xb7   :  { %v308_v33 = vpop.f32.mrf.mxu3  ;;  %v325_v39 = vmax.f32 %v295_v35, 0.0  ;;  %v279_v45 = vadd.f32 %v278_v37, %v99_v41 }
  0xb8   :  { %v309_v36 = vadd.f32 %v308_v33, %v101_v22 }
  0xb9   :  { %v333_v42 = vpack.c.bf16 %v325_v39, %v317_v38  ;;  %v316_v48 = vmax.f32 %v279_v45, 0.0 }
  0xba   :  { %v326_v40 = vmax.f32 %v309_v36, 0.0  ;;  %1039 = vmatpush.bf16.msrb.mxu0 %v1521_v55 }
  0xbb   :  { %943 = vmatmul.bf16.vlgmr.msrb.gmra.mxu2 %v333_v42 }
  0xbc   :  { %v334_v43 = vpack.c.bf16 %v326_v40, %v318_v34 }
  0xbe   :  { %957 = vmatmul.bf16.vlgmr.msrb.gmra.mxu3 %v334_v43  ;;  %v280_v46 = vpop.f32.mrf.mxu1  ;;  %1040 = vmatpush.bf16.msrb.mxu0 %v1520_v57 }
  0xbf   :  { %v281_v47 = vadd.f32 %v280_v46, %v99_v41 }
  0xc1   :  { %v324_v49 = vmax.f32 %v281_v47, 0.0 }
  0xc2   :  { %1041 = vmatpush.bf16.msrb.mxu0 %v1519_v61 }
  0xc3   :  { %v332_v50 = vpack.c.bf16 %v324_v49, %v316_v48 }
  0xc5   :  { %929 = vmatmul.bf16.vlgmr.msra.gmra.mxu1 %v332_v50 }
 0x122   :  { %v860_v56 = vpop.f32.mrf.mxu0 }
 0x123   :  { %v861_v0 = vadd.f32 %v1534_v60, %v860_v56 }
 0x12a   :  { %v862_v63 = vpop.f32.mrf.mxu0 }
 0x12b   :  { %v863_v5 = vadd.f32 %v1534_v60, %v862_v63 }
 0x12e   :  { %v888_v58 = vpop.f32.mrf.mxu2 }
 0x131   :  { %v902_v59 = vpop.f32.mrf.mxu3 }
 0x132   :  { %v874_v62 = vpop.f32.mrf.mxu1  ;;  %v916_v8 = vpop.f32.mrf.mxu0 }
 0x133   :  { %v875_v1 = vadd.f32 %v874_v62, %v861_v0 }
 0x135   :  { %v889_v6 = vadd.f32 %v888_v58, %v875_v1 }
 0x136   :  { %v890_v2 = vpop.f32.mrf.mxu2 }
 0x137   :  { %v903_v9 = vadd.f32 %v902_v59, %v889_v6 }
 0x139   :  { %v904_v3 = vpop.f32.mrf.mxu3  ;;  %v917_v13 = vadd.f32 %v916_v8, %v903_v9 }
 0x13a   :  { %v876_v4 = vpop.f32.mrf.mxu1  ;;  %v918_v17 = vpop.f32.mrf.mxu0 }
 0x13b   :  { %v877_v7 = vadd.f32 %v876_v4, %v863_v5 }
 0x13d   :  { %v891_v10 = vadd.f32 %v890_v2, %v877_v7 }
 0x13e   :  { %v944_v11 = vpop.f32.mrf.mxu2 }
 0x13f   :  { %v905_v15 = vadd.f32 %v904_v3, %v891_v10 }
 0x141   :  { %v958_v14 = vpop.f32.mrf.mxu3  ;;  %v919_v19 = vadd.f32 %v918_v17, %v905_v15 }
 0x142   :  { %v930_v12 = vpop.f32.mrf.mxu1 }
 0x143   :  { %v931_v16 = vadd.f32 %v930_v12, %v917_v13 }
 0x145   :  { %v945_v18 = vadd.f32 %v944_v11, %v931_v16 }
 0x146   :  { %v946_v22 = vpop.f32.mrf.mxu2 }
 0x147   :  { %v959_v23 = vadd.f32 %v958_v14, %v945_v18 }
 0x149   :  { %v960_v25 = vpop.f32.mrf.mxu3  ;;  %v963_v27 = vmax.f32 %v959_v23, 0.0 }
 0x14a   :  { %v932_v20 = vpop.f32.mrf.mxu1 }
 0x14b   :  { %v933_v21 = vadd.f32 %v932_v20, %v919_v19 }
 0x14d   :  { %v947_v24 = vadd.f32 %v946_v22, %v933_v21 }
 0x14f   :  { %v961_v26 = vadd.f32 %v960_v25, %v947_v24 }
 0x151   :  { %v964_v28 = vmax.f32 %v961_v26, 0.0 }
 0x153   :  { %v965_v29 = vpack.c.bf16 %v964_v28, %v963_v27 }
 0x155   :  { %1042 = vmatmul.bf16.vlgmr.msrb.gmra.mxu0 %v965_v29 }
 0x1d2   :  { %v1043_v31 = vpop.f32.mrf.mxu0 }
 0x1d3   :  { %v1044_v32 = vadd.f32 %v1535_v30, %v1043_v31 }
 0x1d5   :  { %1048 = vmax.xlane.f32.xlu0 %v1044_v32 }
 0x1da   :  { %v1045_v33 = vpop.f32.mrf.mxu0 }
 0x1db   :  { %v1046_v34 = vadd.f32 %v1535_v30, %v1045_v33 }
 0x1dd   :  { %1050 = vmax.xlane.f32.xlu0 %v1046_v34 }
 0x248   :  { %v1049_v35 = vpop.xlane.xlu0 %1048 }
 0x249   :  { %v1052_v36 = vsub.f32 %v1044_v32, %v1049_v35 }
 0x24b   :  { %v1054_v37 = vmul.f32 1.442695, %v1052_v36 }
 0x24d   :  { %1536 = vpow2.f32 %v1054_v37 }
 0x250   :  { %v1051_v38 = vpop.xlane.xlu0 %1050 }
 0x251   :  { %v1053_v39 = vsub.f32 %v1046_v34, %v1051_v38 }
 0x253   :  { %v1537_v40 = vpop.eup %1536  ;;  %v1056_v41 = vmul.f32 1.442695, %v1053_v39 }
 0x254   :  { %1058 = vadd.xlane.f32.xlu1 %v1537_v40 }
 0x255   :  { %1538 = vpow2.f32 %v1056_v41 }
 0x25b   :  { %v1539_v42 = vpop.eup %1538 }
 0x25c   :  { %1060 = vadd.xlane.f32.xlu1 %v1539_v42 }
 0x2c7   :  { %v1059_v43 = vpop.xlane.xlu1 %1058 }
 0x2c8   :  { %1540 = vrcp.f32 %v1059_v43 }
 0x2ce   :  { %v1541_v45 = vpop.eup %1540 }
 0x2cf   :  { %v1064_v46 = vmul.f32 %v1541_v45, %v1537_v40  ;;  %v1061_v47 = vpop.xlane.xlu1 %1060 }
 0x2d0   :  { %1542 = vrcp.f32 %v1061_v47 }
 0x2d1   :  { %1066 = vst [vmem:[%s1729_s7] sm:$0xff] %v1064_v46 }
 0x2d6   :  { %v1543_v48 = vpop.eup %1542 }
 0x2d7   :  { %v1065_v49 = vmul.f32 %v1543_v48, %v1539_v42 }
 0x2d9   :  { %1067 = vst [vmem:[%s1729_s7 + $0x8] sm:$0xff] %v1065_v49 }
 0x2da   :  { %1072 = vsyncpa [#allocation3], 1 }
 0x2db   :  { %1073 = vsyncpa [#allocation5], 1 }

</bundles_post_ra>
